<compile_context>
chip_gen: v5e
topology: v5e:2x2
jax: 0.10.0
libtpu: 0.0.40
codegen_flags: <defaults>
</compile_context>

<pallas_src>
from functools import partial

import jax
import jax.numpy as jnp
from jax import lax
from jax.experimental import pallas as pl
from jax.experimental.pallas import tpu as pltpu


def _round_up(x, m):
    return ((x + m - 1) // m) * m


def _is_v7x():
    """Generation check for the megacore tiling heuristic (2 TensorCores per chip)."""
    try:
        kind = jax.devices()[0].device_kind.lower()
        return ("v7" in kind) or ("7x" in kind)
    except Exception:  # pragma: no cover - be conservative off-TPU
        return False


def _pick_tb(batch, tb_request):
    """Largest lane-aligned batch tile <= request (and <= batch rounded up).

    On v7x only, shrink so the step count is even and >= 2 (both TCs get equal work
    under dimension_semantics=("parallel",)).  v5e/v6e keep one big tile: splitting
    there only adds per-step overhead.
    """
    tb = _round_up(max(128, min(int(tb_request), _round_up(batch, 128))), 128)
    if _is_v7x() and batch > 128:
        steps = pl.cdiv(batch, tb)
        target = max(2, steps + (steps % 2))            # next even step count
        tb = max(128, _round_up(pl.cdiv(batch, target), 128))
        while tb > 128 and pl.cdiv(batch, tb) % 2 == 1:  # fix rare rounding fallout
            tb -= 128
    return tb


def _pack_params(weights, biases, embeddings):
    """Pack [out, in] weights + biases + (transposed) embedding tables into one
    (rows, cols) f32 slab.

    Layer li's weight is slab[off:off+fo, :fi]; its bias lives in the fixed
    lane-aligned last column (cols-1).  Embedding table e is stored transposed as
    slab[eoff:eoff+emb_dim, :n_emb].  Every block starts at a sublane-aligned
    (multiple-of-8) row offset so static in-kernel slices never start mid-tile.
    """
    max_w = max(int(w.shape[1]) for w in weights)
    if embeddings:
        max_w = max(max_w, max(int(e.shape[0]) for e in embeddings))
    cols = _round_up(max_w + 1, 128)
    bias_col = cols - 1

    rows = 0
    layer_dims = []
    for w in weights:
        fo, fi = int(w.shape[0]), int(w.shape[1])
        layer_dims.append((fi, fo, rows))
        rows += _round_up(fo, 8)
    emb_dims = []
    for e in embeddings:
        n_emb, emb_dim = int(e.shape[0]), int(e.shape[1])
        emb_dims.append((n_emb, emb_dim, rows))
        rows += _round_up(emb_dim, 8)

    packed = jnp.zeros((rows, cols), jnp.float32)
    for w, b, (fi, fo, off) in zip(weights, biases, layer_dims):
        packed = packed.at[off:off + fo, :fi].set(w.astype(jnp.float32))
        packed = packed.at[off:off + fo, bias_col].set(b.astype(jnp.float32))
    for e, (n_emb, emb_dim, off) in zip(embeddings, emb_dims):
        packed = packed.at[off:off + emb_dim, :n_emb].set(e.T.astype(jnp.float32))
    return packed, tuple(layer_dims), tuple(emb_dims), bias_col


def _autoembedder_kernel(layer_dims, emb_dims, cont_cols, bias_col, *refs):
    """Fused embedding lookup + full Linear(+tanh) chain for one batch tile.

    refs: x_cont_ref (cont_cols, tb) f32/bf16, [x_cat_ref (cat_cols, tb) i32],
          wb_ref (rows, cols) packed params, out_ref (out_features, tb).
    All feature axes sit on sublanes; batch sits on the 128-wide lane axis, so every
    intermediate and the output store is lane-dense.
    """
    if emb_dims:
        x_cont_ref, x_cat_ref, wb_ref, out_ref = refs
    else:
        x_cont_ref, wb_ref, out_ref = refs
        x_cat_ref = None

    tb = x_cont_ref.shape[-1]
    fi0, fo0, off0 = layer_dims[0]

    # --- first layer, split over the (virtual) concat pieces: never build x ----------
    h = jnp.dot(
        wb_ref[off0:off0 + fo0, 0:cont_cols],
        x_cont_ref[...].astype(jnp.float32),
        preferred_element_type=jnp.float32,
    )                                                              # (fo0, tb)
    col = cont_cols
    for ci, (n_emb, emb_dim, eoff) in enumerate(emb_dims):
        ids = x_cat_ref[ci:ci + 1, :]                              # (1, tb) int32
        onehot = (
            lax.broadcasted_iota(jnp.int32, (n_emb, tb), 0) == ids
        ).astype(jnp.float32)                                      # (n_emb, tb)
        piece = jnp.dot(
            wb_ref[eoff:eoff + emb_dim, 0:n_emb], onehot,
            preferred_element_type=jnp.float32,
        )                                                          # (emb_dim, tb)
        h = h + jnp.dot(
            wb_ref[off0:off0 + fo0, col:col + emb_dim], piece,
            preferred_element_type=jnp.float32,
        )
        col += emb_dim
    h = jnp.tanh(h + wb_ref[off0:off0 + fo0, bias_col:bias_col + 1])

    # --- remaining encoder/decoder layers --------------------------------------------
    n_layers = len(layer_dims)
    for li in range(1, n_layers):
        fi, fo, off = layer_dims[li]
        h = jnp.dot(wb_ref[off:off + fo, 0:fi], h, preferred_element_type=jnp.float32)
        h = h + wb_ref[off:off + fo, bias_col:bias_col + 1]
        if li < n_layers - 1:
            # default activation 'tanh'; nn.Dropout(p=0.0) is the identity -> skipped
            h = jnp.tanh(h)
    out_ref[...] = h.astype(out_ref.dtype)


def autoembedder_forward(x_cat, x_cont, params, *, tb=2048,
                         io_dtype=jnp.float32, feature_major_output=False):
    """x_cat: [cat_cols, batch] int, x_cont: [cont_cols, batch] float.

    Returns [batch, in_features] (PyTorch convention) by default, or
    [in_features, batch] with feature_major_output=True (skips the wrapper transpose).
    """
    x_cont = x_cont.astype(io_dtype)
    cont_cols, batch = x_cont.shape
    assert cont_cols >= 1, "kernel assumes at least one continuous feature column"
    embeddings = params.get("embeddings", [])
    has_cat = len(embeddings) > 0
    if has_cat:
        # TODO(synk): JAX/Pallas one-hot lookup clamps out-of-range indices instead of
        # raising like nn.Embedding; indices are not bounds-checked here.
        x_cat = x_cat.astype(jnp.int32)
        cat_cols = int(x_cat.shape[0])
        assert cat_cols == len(embeddings)
    else:
        cat_cols = 0

    weights, biases = params["weights"], params["biases"]
    packed, layer_dims, emb_dims, bias_col = _pack_params(weights, biases, embeddings)
    out_features = layer_dims[-1][1]

    # --- batch tiling: batch on lanes, no padding, cdiv grid --------------------------
    tb = _pick_tb(batch, tb)
    grid = (pl.cdiv(batch, tb),)

    # VMEM sanity: double-buffered blocks + resident slab must fit every generation's
    # scoped default (16 MiB on v5e, 32 MiB on v6e/v7x).  At tb=8192 this is ~1.2 MiB.
    itemsize = jnp.dtype(io_dtype).itemsize
    vmem_est = 2 * tb * (cont_cols * itemsize + cat_cols * 4 + out_features * itemsize)
    vmem_est += 2 * int(packed.size) * 4
    assert vmem_est < 16 * 1024 * 1024, f"unexpected VMEM working set {vmem_est} B"

    in_specs = [pl.BlockSpec((cont_cols, tb), lambda i: (0, i))]
    args = [x_cont]
    if has_cat:
        in_specs.append(pl.BlockSpec((cat_cols, tb), lambda i: (0, i)))
        args.append(x_cat)
    in_specs.append(pl.BlockSpec(packed.shape, lambda i: (0, 0)))   # resident slab
    args.append(packed)

    # Accurate advisory cost: the kernel is HBM/step-overhead bound (features << 128).
    mac_flops = 2 * batch * sum(fi * fo for fi, fo, _ in layer_dims)
    mac_flops += batch * sum(fo for _, fo, _ in layer_dims)          # bias adds
    mac_flops += 2 * batch * sum(
        n_emb * emb_dim + emb_dim * layer_dims[0][1] for n_emb, emb_dim, _ in emb_dims
    )
    transcendentals = batch * sum(fo for _, fo, _ in layer_dims[:-1])
    bytes_accessed = (
        batch * (cont_cols + out_features) * itemsize
        + batch * cat_cols * 4
        + int(packed.size) * 4
    )

    out = pl.pallas_call(
        partial(_autoembedder_kernel, layer_dims, emb_dims, cont_cols, bias_col),
        out_shape=jax.ShapeDtypeStruct((out_features, batch), io_dtype),
        grid_spec=pltpu.PrefetchScalarGridSpec(
            num_scalar_prefetch=0,
            grid=grid,
            in_specs=in_specs,
            out_specs=pl.BlockSpec((out_features, tb), lambda i: (0, i)),
        ),
        compiler_params=pltpu.CompilerParams(dimension_semantics=("parallel",)),
        cost_estimate=pl.CostEstimate(
            flops=int(mac_flops),
            transcendentals=int(transcendentals),
            bytes_accessed=int(bytes_accessed),
        ),
    )(*args)

    if feature_major_output:
        return out                      # [features, batch] -- no extra HBM pass
    return out.T                        # PyTorch convention [batch, features]


def reference_forward(x_cat, x_cont, params):
    """Pure-JAX reference mirroring the PyTorch forward (weights in [out, in] order)."""
    x = x_cont.astype(jnp.float32).T
    embs = [w[x_cat[i].astype(jnp.int32)] for i, w in enumerate(params["embeddings"])]
    if embs:
        x = jnp.concatenate([x] + embs, axis=1)
    n = len(params["weights"])
    for li, (w, b) in enumerate(zip(params["weights"], params["biases"])):
        x = x @ w.T + b
        if li < n - 1:
            x = jnp.tanh(x)
    return x


def make_params(key, num_cont_features, embedding_sizes, hidden_layers):
    """Deterministic parameter init (xavier-normal weights, PyTorch [out, in] layout)."""
    emb_total = sum(d for _, d in embedding_sizes)
    in_features = num_cont_features + emb_total
    hl = hidden_layers
    dims = [(in_features, hl[0][0])]
    dims += [(hl[x][0], hl[x][1]) for x in range(len(hl))]
    dims += [(hl[x][1], hl[x][0]) for x in reversed(range(len(hl)))]
    dims += [(hl[0][0], in_features)]

    keys = jax.random.split(key, 2 * len(dims) + max(1, len(embedding_sizes)))
    weights, biases = [], []
    for li, (fi, fo) in enumerate(dims):
        std = (2.0 / (fi + fo)) ** 0.5
        weights.append(std * jax.random.normal(keys[2 * li], (fo, fi), jnp.float32))
        biases.append(0.01 * jax.random.normal(keys[2 * li + 1], (fo,), jnp.float32))
    embeddings = []
    for ei, (n_emb, d_emb) in enumerate(embedding_sizes):
        embeddings.append(
            jax.random.normal(keys[2 * len(dims) + ei], (n_emb, d_emb), jnp.float32)
        )
    return {"weights": weights, "biases": biases, "embeddings": embeddings}, in_features


if __name__ == "__main__":
    # Small but lane-dense shapes. Default tb (2048) is clamped to the batch, so the
    # whole batch runs in 1 large lane-dense tile (2 even tiles on v7x) -- never tb=128.
    batch = 512
    num_cont_features = 4
    embedding_sizes = [(10, 3), (7, 5)]          # -> emb dims 3 + 5, in_features = 12
    hidden_layers = [(8, 4), (4, 2)]             # config['hidden_layers']

    key = jax.random.PRNGKey(0)
    kp, kcat, kcont = jax.random.split(key, 3)
    params, in_features = make_params(kp, num_cont_features, embedding_sizes, hidden_layers)

    # inputs follow the PyTorch convention: [columns count, batch size]
    x_cat = jnp.stack(
        [
            jax.random.randint(jax.random.fold_in(kcat, i), (batch,), 0, n, jnp.int32)
            for i, (n, _) in enumerate(embedding_sizes)
        ],
        axis=0,
    )                                             # [2, 512]
    x_cont = jax.random.normal(kcont, (num_cont_features, batch), jnp.float32)  # [4, 512]

    out = autoembedder_forward(x_cat, x_cont, params)   # default tb, f32 I/O
    out = jax.block_until_ready(out)

    ref = reference_forward(x_cat, x_cont, params)
    assert out.shape == (batch, in_features), out.shape
    assert jnp.allclose(out, ref, atol=1e-4, rtol=1e-4), "mismatch vs reference"

    print("KERNEL_OK")
</pallas_src>

<mosaic_0001>
module attributes {stable_mosaic.version = 11 : i64} {
  func.func @_autoembedder_kernel(%arg0: i32, %arg1: memref<4x512xf32, #tpu.memory_space<vmem>>, %arg2: memref<2x512xi32, #tpu.memory_space<vmem>>, %arg3: memref<72x128xf32, #tpu.memory_space<vmem>>, %arg4: memref<12x512xf32, #tpu.memory_space<vmem>>) attributes {dimension_semantics = [#tpu.dimension_semantics<parallel>], iteration_bounds = array<i64: 1>, scalar_prefetch = 0 : i64, scratch_operands = 0 : i64, tpu.core_type = #tpu.core_type<tc>, window_params = [{transform_indices = @transform_0, window_bounds = array<i64: 4, 512>}, {transform_indices = @transform_1, window_bounds = array<i64: 2, 512>}, {pipeline_mode = #tpu.pipeline_mode<synchronous>, transform_indices = @transform_2, window_bounds = array<i64: 72, 128>}, {transform_indices = @transform_3, window_bounds = array<i64: 12, 512>}]} {
    %c0 = arith.constant 0 : index
    %c0_0 = arith.constant 0 : index
    %0 = vector.load %arg3[%c0, %c0_0] : memref<72x128xf32, #tpu.memory_space<vmem>>, vector<8x4xf32>
    %c0_1 = arith.constant 0 : index
    %c0_2 = arith.constant 0 : index
    %1 = vector.load %arg1[%c0_1, %c0_2] : memref<4x512xf32, #tpu.memory_space<vmem>>, vector<4x512xf32>
    %cst = arith.constant dense<0.000000e+00> : vector<8x512xf32>
    %2 = tpu.matmul %0, %1, %cst {dimension_numbers = #tpu.dot_dimension_numbers<[1], [0], [0], [1], [0, 0, 1, 1], [], []>} : vector<8x4xf32>, vector<4x512xf32>, vector<8x512xf32> -> vector<8x512xf32>
    %c0_3 = arith.constant 0 : index
    %c0_4 = arith.constant 0 : index
    %3 = vector.load %arg2[%c0_3, %c0_4] : memref<2x512xi32, #tpu.memory_space<vmem>>, vector<1x512xi32>
    %4 = tpu.iota {dimensions = array<i32: 0>} : vector<10x512xi32>
    %5 = vector.broadcast %3 : vector<1x512xi32> to vector<10x512xi32>
    %6 = arith.cmpi eq, %4, %5 : vector<10x512xi32>
    %7 = arith.extui %6 : vector<10x512xi1> to vector<10x512xi32>
    %8 = arith.sitofp %7 : vector<10x512xi32> to vector<10x512xf32>
    %c56 = arith.constant 56 : index
    %c0_5 = arith.constant 0 : index
    %9 = vector.load %arg3[%c56, %c0_5] : memref<72x128xf32, #tpu.memory_space<vmem>>, vector<3x10xf32>
    %cst_6 = arith.constant dense<0.000000e+00> : vector<3x512xf32>
    %10 = tpu.matmul %9, %8, %cst_6 {dimension_numbers = #tpu.dot_dimension_numbers<[1], [0], [0], [1], [0, 0, 1, 1], [], []>} : vector<3x10xf32>, vector<10x512xf32>, vector<3x512xf32> -> vector<3x512xf32>
    %c0_7 = arith.constant 0 : index
    %c4 = arith.constant 4 : index
    %11 = vector.load %arg3[%c0_7, %c4] : memref<72x128xf32, #tpu.memory_space<vmem>>, vector<8x3xf32>
    %cst_8 = arith.constant dense<0.000000e+00> : vector<8x512xf32>
    %12 = tpu.matmul %11, %10, %cst_8 {dimension_numbers = #tpu.dot_dimension_numbers<[1], [0], [0], [1], [0, 0, 1, 1], [], []>} : vector<8x3xf32>, vector<3x512xf32>, vector<8x512xf32> -> vector<8x512xf32>
    %13 = arith.addf %2, %12 : vector<8x512xf32>
    %c1 = arith.constant 1 : index
    %c0_9 = arith.constant 0 : index
    %14 = vector.load %arg2[%c1, %c0_9] : memref<2x512xi32, #tpu.memory_space<vmem>>, vector<1x512xi32>
    %15 = tpu.iota {dimensions = array<i32: 0>} : vector<7x512xi32>
    %16 = vector.broadcast %14 : vector<1x512xi32> to vector<7x512xi32>
    %17 = arith.cmpi eq, %15, %16 : vector<7x512xi32>
    %18 = arith.extui %17 : vector<7x512xi1> to vector<7x512xi32>
    %19 = arith.sitofp %18 : vector<7x512xi32> to vector<7x512xf32>
    %c64 = arith.constant 64 : index
    %c0_10 = arith.constant 0 : index
    %20 = vector.load %arg3[%c64, %c0_10] : memref<72x128xf32, #tpu.memory_space<vmem>>, vector<5x7xf32>
    %cst_11 = arith.constant dense<0.000000e+00> : vector<5x512xf32>
    %21 = tpu.matmul %20, %19, %cst_11 {dimension_numbers = #tpu.dot_dimension_numbers<[1], [0], [0], [1], [0, 0, 1, 1], [], []>} : vector<5x7xf32>, vector<7x512xf32>, vector<5x512xf32> -> vector<5x512xf32>
    %c0_12 = arith.constant 0 : index
    %c7 = arith.constant 7 : index
    %22 = vector.load %arg3[%c0_12, %c7] : memref<72x128xf32, #tpu.memory_space<vmem>>, vector<8x5xf32>
    %cst_13 = arith.constant dense<0.000000e+00> : vector<8x512xf32>
    %23 = tpu.matmul %22, %21, %cst_13 {dimension_numbers = #tpu.dot_dimension_numbers<[1], [0], [0], [1], [0, 0, 1, 1], [], []>} : vector<8x5xf32>, vector<5x512xf32>, vector<8x512xf32> -> vector<8x512xf32>
    %24 = arith.addf %13, %23 : vector<8x512xf32>
    %c0_14 = arith.constant 0 : index
    %c127 = arith.constant 127 : index
    %25 = vector.load %arg3[%c0_14, %c127] : memref<72x128xf32, #tpu.memory_space<vmem>>, vector<8x1xf32>
    %26 = vector.broadcast %25 : vector<8x1xf32> to vector<8x512xf32>
    %27 = arith.addf %24, %26 : vector<8x512xf32>
    %28 = math.tanh %27 : vector<8x512xf32>
    %c8 = arith.constant 8 : index
    %c0_15 = arith.constant 0 : index
    %29 = vector.load %arg3[%c8, %c0_15] : memref<72x128xf32, #tpu.memory_space<vmem>>, vector<4x8xf32>
    %cst_16 = arith.constant dense<0.000000e+00> : vector<4x512xf32>
    %30 = tpu.matmul %29, %28, %cst_16 {dimension_numbers = #tpu.dot_dimension_numbers<[1], [0], [0], [1], [0, 0, 1, 1], [], []>} : vector<4x8xf32>, vector<8x512xf32>, vector<4x512xf32> -> vector<4x512xf32>
    %c8_17 = arith.constant 8 : index
    %c127_18 = arith.constant 127 : index
    %31 = vector.load %arg3[%c8_17, %c127_18] : memref<72x128xf32, #tpu.memory_space<vmem>>, vector<4x1xf32>
    %32 = vector.broadcast %31 : vector<4x1xf32> to vector<4x512xf32>
    %33 = arith.addf %30, %32 : vector<4x512xf32>
    %34 = math.tanh %33 : vector<4x512xf32>
    %c16 = arith.constant 16 : index
    %c0_19 = arith.constant 0 : index
    %35 = vector.load %arg3[%c16, %c0_19] : memref<72x128xf32, #tpu.memory_space<vmem>>, vector<2x4xf32>
    %cst_20 = arith.constant dense<0.000000e+00> : vector<2x512xf32>
    %36 = tpu.matmul %35, %34, %cst_20 {dimension_numbers = #tpu.dot_dimension_numbers<[1], [0], [0], [1], [0, 0, 1, 1], [], []>} : vector<2x4xf32>, vector<4x512xf32>, vector<2x512xf32> -> vector<2x512xf32>
    %c16_21 = arith.constant 16 : index
    %c127_22 = arith.constant 127 : index
    %37 = vector.load %arg3[%c16_21, %c127_22] : memref<72x128xf32, #tpu.memory_space<vmem>>, vector<2x1xf32>
    %38 = vector.broadcast %37 : vector<2x1xf32> to vector<2x512xf32>
    %39 = arith.addf %36, %38 : vector<2x512xf32>
    %40 = math.tanh %39 : vector<2x512xf32>
    %c24 = arith.constant 24 : index
    %c0_23 = arith.constant 0 : index
    %41 = vector.load %arg3[%c24, %c0_23] : memref<72x128xf32, #tpu.memory_space<vmem>>, vector<4x2xf32>
    %cst_24 = arith.constant dense<0.000000e+00> : vector<4x512xf32>
    %42 = tpu.matmul %41, %40, %cst_24 {dimension_numbers = #tpu.dot_dimension_numbers<[1], [0], [0], [1], [0, 0, 1, 1], [], []>} : vector<4x2xf32>, vector<2x512xf32>, vector<4x512xf32> -> vector<4x512xf32>
    %c24_25 = arith.constant 24 : index
    %c127_26 = arith.constant 127 : index
    %43 = vector.load %arg3[%c24_25, %c127_26] : memref<72x128xf32, #tpu.memory_space<vmem>>, vector<4x1xf32>
    %44 = vector.broadcast %43 : vector<4x1xf32> to vector<4x512xf32>
    %45 = arith.addf %42, %44 : vector<4x512xf32>
    %46 = math.tanh %45 : vector<4x512xf32>
    %c32 = arith.constant 32 : index
    %c0_27 = arith.constant 0 : index
    %47 = vector.load %arg3[%c32, %c0_27] : memref<72x128xf32, #tpu.memory_space<vmem>>, vector<8x4xf32>
    %cst_28 = arith.constant dense<0.000000e+00> : vector<8x512xf32>
    %48 = tpu.matmul %47, %46, %cst_28 {dimension_numbers = #tpu.dot_dimension_numbers<[1], [0], [0], [1], [0, 0, 1, 1], [], []>} : vector<8x4xf32>, vector<4x512xf32>, vector<8x512xf32> -> vector<8x512xf32>
    %c32_29 = arith.constant 32 : index
    %c127_30 = arith.constant 127 : index
    %49 = vector.load %arg3[%c32_29, %c127_30] : memref<72x128xf32, #tpu.memory_space<vmem>>, vector<8x1xf32>
    %50 = vector.broadcast %49 : vector<8x1xf32> to vector<8x512xf32>
    %51 = arith.addf %48, %50 : vector<8x512xf32>
    %52 = math.tanh %51 : vector<8x512xf32>
    %c40 = arith.constant 40 : index
    %c0_31 = arith.constant 0 : index
    %53 = vector.load %arg3[%c40, %c0_31] : memref<72x128xf32, #tpu.memory_space<vmem>>, vector<12x8xf32>
    %cst_32 = arith.constant dense<0.000000e+00> : vector<12x512xf32>
    %54 = tpu.matmul %53, %52, %cst_32 {dimension_numbers = #tpu.dot_dimension_numbers<[1], [0], [0], [1], [0, 0, 1, 1], [], []>} : vector<12x8xf32>, vector<8x512xf32>, vector<12x512xf32> -> vector<12x512xf32>
    %c40_33 = arith.constant 40 : index
    %c127_34 = arith.constant 127 : index
    %55 = vector.load %arg3[%c40_33, %c127_34] : memref<72x128xf32, #tpu.memory_space<vmem>>, vector<12x1xf32>
    %56 = vector.broadcast %55 : vector<12x1xf32> to vector<12x512xf32>
    %57 = arith.addf %54, %56 : vector<12x512xf32>
    %c0_35 = arith.constant 0 : index
    %c0_36 = arith.constant 0 : index
    %58 = vector.load %arg4[%c0_35, %c0_36] : memref<12x512xf32, #tpu.memory_space<vmem>>, vector<12x512xf32>
    tpu.vector_store %arg4[%c0_35, %c0_36], %57 {strides = array<i32>} : memref<12x512xf32, #tpu.memory_space<vmem>>, vector<12x512xf32>,
    return
  }
  func.func @transform_0(%arg0: i32) -> (i32, i32) {
    %c0_i32 = arith.constant 0 : i32
    %c0_i32_0 = arith.constant 0 : i32
    return %c0_i32, %arg0 : i32, i32
  }
  func.func @transform_1(%arg0: i32) -> (i32, i32) {
    %c0_i32 = arith.constant 0 : i32
    %c0_i32_0 = arith.constant 0 : i32
    return %c0_i32, %arg0 : i32, i32
  }
  func.func @transform_2(%arg0: i32) -> (i32, i32) {
    %c0_i32 = arith.constant 0 : i32
    %c0_i32_0 = arith.constant 0 : i32
    %c0_i32_1 = arith.constant 0 : i32
    return %c0_i32, %c0_i32_0 : i32, i32
  }
  func.func @transform_3(%arg0: i32) -> (i32, i32) {
    %c0_i32 = arith.constant 0 : i32
    %c0_i32_0 = arith.constant 0 : i32
    return %c0_i32, %arg0 : i32, i32
  }
}

</mosaic_0001>

<bundles_post_ra>
// kernel: tpu_custom_call.1
= control target key start
LH: loop header
LB: loop body
LE: loop exit
PB: predicated region body
PF: predicated region fallthrough
CT: control target
= control target key end

     0   :  { %8 = vsyncpa [#allocation3], 0  ;;  %s1570_s0 = inlined_call_operand.hbm [shape: f32[4,512], index: 0, kind: input, shape index: {}]   ;;  %s1571_s1 = inlined_call_operand.hbm [shape: s32[2,512], index: 1, kind: input, shape index: {}]   ;;  %s1572_s2 = inlined_call_operand.hbm [shape: f32[72,128], index: 2, kind: input, shape index: {}]   ;;  %s1573_s3 = inlined_call_operand.hbm [shape: f32[12,512], index: 3, kind: output, shape index: {}]  }
   0x1   :  { %9 = vsyncpa [#allocation6], 0  ;;  %s27_s14 = sshll.u32 %s1571_s1, 4  ;;  %s28_s14 = int_to_ptr.hbm [resolvable:$true] %s27_s14 }
   0x2   :  { %10 = vsyncpa [#allocation4], 0  ;;  %s1415_s15 = smov [#allocation5]   ;;  %s16_s19 = sshll.u32 %s1570_s0, 4  ;;  %s17_s19 = int_to_ptr.hbm [resolvable:$true] %s16_s19 }
   0x3   :  { %s29_s16 = sshll.u32 %s1415_s15, 4  ;;  %s1416_s20 = smov [#allocation2]   ;;  %s30_s16 = int_to_ptr.vmem [resolvable:$true] %s29_s16 }
   0x4   :  { %32 = dma.hbm_to_vmem [thread:$0]  %s28_s14, 128, %s30_s16, [#allocation6]  }
   0x5   :  { %s18_s21 = sshll.u32 %s1416_s20, 4  ;;  %s37_s24 = sshll.u32 %s1572_s2, 4  ;;  %s19_s21 = int_to_ptr.vmem [resolvable:$true] %s18_s21  ;;  %s38_s24 = int_to_ptr.hbm [resolvable:$true] %s37_s24 }
   0x6   :  { %21 = dma.hbm_to_vmem [thread:$0]  %s17_s19, 256, %s19_s21, [#allocation3]  }
   0x7   :  { %s1417_s1 = smov [#allocation7]   ;;  %s1418_s26 = smov 128  }
   0x8   :  { %s39_s25 = sshll.u32 %s1417_s1, 4  ;;  %s1419_s27 = smov 8   ;;  %s40_s25 = int_to_ptr.vmem [resolvable:$true] %s39_s25 }
   0x9   :  { %45 = dma.hbm_to_vmem [thread:$0]  %s38_s24, 1152, %s40_s25, [#allocation6], %s1418_s26, %s1418_s26, %s1419_s27  }
   0xa   :  { %1409 = dma.done.wait [#allocation3], 256  }
   0xb   :  { %1410 = vsyncadd [#allocation3], 4294967040 }
   0xc   :  { %1411 = dma.done.wait [#allocation6], 1280  }
   0xd   :  { %1412 = vsyncadd [#allocation6], 4294966016  ;;  %v62_v0 = vlaneseq  ;;  %v61_v3 = vld [vmem:[#allocation5] ss:$2 sm:$0xf]  ;;  %v1460_v4 = vld [vmem:[#allocation7] sm:$0xff] }
   0xe   :  { %v65_v5 = vperm.slane %v61_v3, 0  ;;  %v66_v6 = vperm.slane %v61_v3, 1  ;;  %v67_v7 = vperm.slane %v61_v3, 2  ;;  %v68_v8 = vperm.slane %v61_v3, 3  ;;  %s1420_s0 = smov 124   ;;  %s1423_s2 = smov 121  }
   0xf   :  { %v1457_v1 = vshrl.u32 %v62_v0, 7  ;;  %192 = vrot.lane.b32.xlu0 %v1460_v4, %s1420_s0  ;;  %vm98_vm0 = vcmask 1041408   ;;  %v1421_v9 = vmov 0.0   ;;  %v93_v14 = vld [vmem:[#allocation7 + $0x38] sm:$0x7]  ;;  %vm94_vm9 = vcmask 80896  }
  0x10   :  { %v1422_v15 = vmov 1.0   ;;  %v59_v16 = vld [vmem:[#allocation2] sm:$0xff]  ;;  %v60_v17 = vld [vmem:[#allocation2 + $0x8] sm:$0xff]  ;;  %v392_v18 = vld [vmem:[#allocation5 + $0x1] ss:$2 sm:$0xf] }
  0x11   :  { %v64_v2 = vadd.s32 8, %v1457_v1  ;;  %vm69_vm5 = vcmp.eq.s32.totalorder %v1457_v1, %v65_v5  ;;  %vm70_vm6 = vcmp.eq.s32.totalorder %v1457_v1, %v66_v6  ;;  %vm71_vm7 = vcmp.eq.s32.totalorder %v1457_v1, %v67_v7  ;;  %292 = vst [vmem:[#allocation1] ss:$2 sm:$0xff] %v59_v16  ;;  %v409_v36 = vld [vmem:[#allocation7 + $0x40] sm:$0x1f]  ;;  %v1509_v47 = vld [vmem:[#allocation7 + $0x28] sm:$0xff] }
  0x12   :  { %vm72_vm8 = vcmp.eq.s32.totalorder %v1457_v1, %v68_v8  ;;  %294 = vst [vmem:[#allocation1 + $0x10] ss:$2 sm:$0xff] %v60_v17  ;;  %v393_v19 = vperm.slane %v392_v18, 0  ;;  %v394_v20 = vperm.slane %v392_v18, 1  ;;  %vm197_vm10 = vcmask 1042432   ;;  %s1425_s28 = smov [#allocation8]  }
  0x13   :  { %vm73_vm1 = vcmp.eq.s32.totalorder %v64_v2, %v65_v5  ;;  %vm74_vm2 = vcmp.eq.s32.totalorder %v64_v2, %v66_v6  ;;  %vm75_vm3 = vcmp.eq.s32.totalorder %v64_v2, %v67_v7  ;;  %vm76_vm4 = vcmp.eq.s32.totalorder %v64_v2, %v68_v8  ;;  %v623_v40 = vld [vmem:[#allocation7 + $0x8] sm:$0xf]  ;;  %v820_v16 = vld [vmem:[#allocation7 + $0x18] sm:$0xf]  ;;  %s1149_s29 = sshll.u32 %s1425_s28, 4  ;;  %s1151_s5 = sshll.u32 %s1573_s3, 4  ;;  %s1150_s29 = int_to_ptr.vmem [resolvable:$true] %s1149_s29  ;;  %s1152_s5 = int_to_ptr.hbm [resolvable:$true] %s1151_s5 }
  0x14   :  { %v1169_v10 = vsel %vm73_vm1, 1.0, %v1421_v9  ;;  %v1170_v11 = vsel %vm74_vm2, 1.0, %v1421_v9  ;;  %v1171_v12 = vsel %vm75_vm3, 1.0, %v1421_v9  ;;  %v1172_v13 = vsel %vm76_vm4, 1.0, %v1421_v9  ;;  %s1426_s6 = smov 512   ;;  %s1427_s7 = smov 32  }
  0x15   :  { %1173 = vmatpush.msk.msra.mxu0 %vm98_vm0, %v1169_v10  ;;  %1176 = vmatpush.msk.msra.mxu1 %vm98_vm0, %v1170_v11  ;;  %vm397_vm11 = vcmp.eq.s32.totalorder %v1457_v1, %v393_v19  ;;  %vm398_vm12 = vcmp.eq.s32.totalorder %v1457_v1, %v394_v20  ;;  %vm194_vm13 = vcmask 23552   ;;  %vm302_vm14 = vcmask 1043456   ;;  %v716_v10 = vld [vmem:[#allocation7 + $0x10] sm:$0x3] }
  0x16   :  { %1179 = vmatpush.msk.msra.mxu2 %vm98_vm0, %v1171_v12  ;;  %1182 = vmatpush.msk.msra.mxu3 %vm98_vm0, %v1172_v13  ;;  %v1201_v26 = vsel %vm397_vm11, 1.0, %v1421_v9  ;;  %vm414_vm15 = vcmask 1046528   ;;  %v1202_v27 = vsel %vm398_vm12, 1.0, %v1421_v9  ;;  %v395_v28 = vperm.slane %v392_v18, 2  ;;  %v1527_v19 = vld [vmem:[#allocation7 + $0x30] sm:$0xf] }
  0x17   :  { %1174 = vmatpush.msk.msra.mxu0 %vm69_vm5, %v1422_v15  ;;  %1177 = vmatpush.msk.msra.mxu1 %vm70_vm6, %v1422_v15  ;;  %v396_v29 = vperm.slane %v392_v18, 3  ;;  %vm299_vm3 = vcmask 31744   ;;  %vm410_vm4 = vcmask 56320   ;;  %v1424_v37 = vmov 127  }
  0x18   :  { %1180 = vmatpush.msk.msra.mxu2 %vm71_vm7, %v1422_v15  ;;  %1183 = vmatpush.msk.msra.mxu3 %vm72_vm8, %v1422_v15  ;;  %v295_v22 = vld.sshfl [vmem:[#allocation1] sm:$0xff pattern:$0x75316420]  ;;  %v296_v25 = vld.sshfl [vmem:[#allocation1 + $0x8] sm:$0xff pattern:$0x75316420]  ;;  %vm399_vm1 = vcmp.eq.s32.totalorder %v1457_v1, %v395_v28 }
  0x19   :  { %1175 = vmatmul.msk.f32.vlgmr.msra.gmra.mxu0 %vm94_vm9, %v93_v14  ;;  %1178 = vmatmul.msk.f32.vlgmr.msra.gmra.mxu1 %vm94_vm9, %v93_v14  ;;  %vm400_vm2 = vcmp.eq.s32.totalorder %v1457_v1, %v396_v29  ;;  %v297_v32 = vld.sshfl [vmem:[#allocation1 + $0x10] sm:$0xff pattern:$0x75316420]  ;;  %v298_v33 = vld.sshfl [vmem:[#allocation1 + $0x18] sm:$0xff pattern:$0x75316420] }
  0x1a   :  { %1181 = vmatmul.msk.f32.vlgmr.msra.gmra.mxu2 %vm94_vm9, %v93_v14  ;;  %1184 = vmatmul.msk.f32.vlgmr.msra.gmra.mxu3 %vm94_vm9, %v93_v14  ;;  %v1203_v34 = vsel %vm399_vm1, 1.0, %v1421_v9  ;;  %v1204_v35 = vsel %vm400_vm2, 1.0, %v1421_v9  ;;  %vm514_vm5 = vcmask 1044480   ;;  %vm511_vm6 = vcmask 39936  }
  0x1b   :  { %509 = vrot.lane.b32.xlu0 %v1460_v4, %s1423_s2  ;;  %1270 = vset.pattern.permute.xlu1 %v1424_v37  ;;  %vm629_vm7 = vcmask 64512   ;;  %vm826_vm8 = vcmask 15360  }
  0x1c   :  { %1271 = vset.pattern.permute.xlu2 %v1424_v37  ;;  %612 = vperm.xlu1 %1270, %v1460_v4  }
  0x1d   :  { %1272 = vset.pattern.permute.xlu0 %v1424_v37  ;;  %719 = vperm.xlu2 %1271, %v716_v10  }
  0x24   :  { %626 = vperm.xlu1 %1270, %v623_v40  }
  0x25   :  { %823 = vperm.xlu2 %1271, %v820_v16  }
  0x2c   :  { %1033 = vperm.xlu1 %1270, %v1509_v47  }
  0x2d   :  { %1038 = vperm.xlu2 %1271, %v1527_v19  }
  0x81   :  { %v193_v21 = vpop.permute.xlu0 %192 }
  0x8d   :  { %v510_v48 = vpop.permute.xlu0 %509 }
  0x8e   :  { %v613_v57 = vpop.permute.xlu1 %612 }
  0x96   :  { %v128_v23 = vpop.f32.mrf.mxu0  ;;  %v148_v24 = vpop.f32.mrf.mxu1 }
  0x97   :  { %1185 = vmatpush.msk.msrb.mxu0 %vm197_vm10, %v128_v23  ;;  %1187 = vmatpush.msk.msrb.mxu1 %vm197_vm10, %v148_v24  ;;  %v627_v11 = vpop.permute.xlu1 %626 }
  0x98   :  { %1186 = vmatmul.msk.f32.vlgmr.msrb.gmra.mxu0 %vm194_vm13, %v193_v21  ;;  %1188 = vmatmul.msk.f32.vlgmr.msrb.gmra.mxu1 %vm194_vm13, %v193_v21 }
  0x99   :  { %1193 = vmatpush.msk.msra.mxu0 %vm302_vm14, %v295_v22  ;;  %1195 = vmatpush.msk.msra.mxu1 %vm302_vm14, %v296_v25 }
  0x9b   :  { %1205 = vmatpush.msk.msrb.mxu0 %vm414_vm15, %v1201_v26  ;;  %1207 = vmatpush.msk.msrb.mxu1 %vm414_vm15, %v1202_v27  ;;  %v720_v26 = vpop.permute.xlu2 %719 }
  0x9d   :  { %v168_v30 = vpop.f32.mrf.mxu2  ;;  %v188_v31 = vpop.f32.mrf.mxu3 }
  0x9e   :  { %1189 = vmatpush.msk.msrb.mxu2 %vm197_vm10, %v168_v30  ;;  %1191 = vmatpush.msk.msrb.mxu3 %vm197_vm10, %v188_v31 }
  0x9f   :  { %1190 = vmatmul.msk.f32.vlgmr.msrb.gmra.mxu2 %vm194_vm13, %v193_v21  ;;  %1192 = vmatmul.msk.f32.vlgmr.msrb.gmra.mxu3 %vm194_vm13, %v193_v21 }
  0xa0   :  { %1194 = vmatmul.msk.f32.vlgmr.msra.gmra.mxu0 %vm299_vm3, %v1460_v4  ;;  %1196 = vmatmul.msk.f32.vlgmr.msra.gmra.mxu1 %vm299_vm3, %v1460_v4 }
  0xa1   :  { %1197 = vmatpush.msk.msra.mxu2 %vm302_vm14, %v297_v32  ;;  %1199 = vmatpush.msk.msra.mxu3 %vm302_vm14, %v298_v33 }
  0xa3   :  { %1209 = vmatpush.msk.msrb.mxu2 %vm414_vm15, %v1203_v34  ;;  %1211 = vmatpush.msk.msrb.mxu3 %vm414_vm15, %v1204_v35 }
  0xa7   :  { %1198 = vmatmul.msk.f32.vlgmr.msra.gmra.mxu2 %vm299_vm3, %v1460_v4  ;;  %1200 = vmatmul.msk.f32.vlgmr.msra.gmra.mxu3 %vm299_vm3, %v1460_v4 }
  0xa8   :  { %1206 = vmatmul.msk.f32.vlgmr.msrb.gmra.mxu0 %vm410_vm4, %v409_v36  ;;  %1208 = vmatmul.msk.f32.vlgmr.msrb.gmra.mxu1 %vm410_vm4, %v409_v36 }
  0xaf   :  { %1210 = vmatmul.msk.f32.vlgmr.msrb.gmra.mxu2 %vm410_vm4, %v409_v36  ;;  %1212 = vmatmul.msk.f32.vlgmr.msrb.gmra.mxu3 %vm410_vm4, %v409_v36 }
 0x115   :  { %v227_v38 = vpop.f32.mrf.mxu0  ;;  %v247_v39 = vpop.f32.mrf.mxu1 }
 0x11d   :  { %v328_v41 = vpop.f32.mrf.mxu0  ;;  %v348_v42 = vpop.f32.mrf.mxu1 }
 0x11e   :  { %v329_v43 = vadd.f32 %v328_v41, %v227_v38  ;;  %v349_v44 = vadd.f32 %v348_v42, %v247_v39  ;;  %v925_v39 = vld [vmem:[#allocation7 + $0x20] sm:$0xff] }
 0x11f   :  { %928 = vperm.xlu0 %1272, %v925_v39  }
 0x122   :  { %v267_v45 = vpop.f32.mrf.mxu2  ;;  %v287_v46 = vpop.f32.mrf.mxu3 }
 0x125   :  { %v444_v49 = vpop.f32.mrf.mxu0  ;;  %v464_v50 = vpop.f32.mrf.mxu1 }
 0x126   :  { %1213 = vmatpush.msk.msra.mxu0 %vm514_vm5, %v444_v49  ;;  %1215 = vmatpush.msk.msra.mxu1 %vm514_vm5, %v464_v50 }
 0x127   :  { %1214 = vmatmul.msk.f32.vlgmr.msra.gmra.mxu0 %vm511_vm6, %v510_v48  ;;  %1216 = vmatmul.msk.f32.vlgmr.msra.gmra.mxu1 %vm511_vm6, %v510_v48 }
 0x12a   :  { %v368_v51 = vpop.f32.mrf.mxu2  ;;  %v388_v52 = vpop.f32.mrf.mxu3 }
 0x12b   :  { %v369_v53 = vadd.f32 %v368_v51, %v267_v45  ;;  %v389_v54 = vadd.f32 %v388_v52, %v287_v46 }
 0x132   :  { %v484_v55 = vpop.f32.mrf.mxu2  ;;  %v504_v56 = vpop.f32.mrf.mxu3 }
 0x133   :  { %1217 = vmatpush.msk.msra.mxu2 %vm514_vm5, %v484_v55  ;;  %1219 = vmatpush.msk.msra.mxu3 %vm514_vm5, %v504_v56 }
 0x134   :  { %1218 = vmatmul.msk.f32.vlgmr.msra.gmra.mxu2 %vm511_vm6, %v510_v48  ;;  %1220 = vmatmul.msk.f32.vlgmr.msra.gmra.mxu3 %vm511_vm6, %v510_v48 }
 0x1a4   :  { %v544_v58 = vpop.f32.mrf.mxu0  ;;  %v564_v59 = vpop.f32.mrf.mxu1 }
 0x1a5   :  { %v607_v60 = vadd.f32 %v544_v58, %v329_v43  ;;  %v608_v61 = vadd.f32 %v564_v59, %v349_v44 }
 0x1a7   :  { %v615_v62 = vadd.f32 %v613_v57, %v607_v60  ;;  %v616_v63 = vadd.f32 %v613_v57, %v608_v61 }
 0x1a9   :  { %1273 = vtanh.f32 %v615_v62 }
 0x1aa   :  { %1275 = vtanh.f32 %v616_v63 }
 0x1af   :  { %v1274_v0 = vpop.eup %1273 }
 0x1b0   :  { %v1276_v1 = vpop.eup %1275  ;;  %647 = vmatpush.msrb.mxu0 %v1274_v0 }
 0x1b1   :  { %667 = vmatpush.msrb.mxu1 %v1276_v1  ;;  %1221 = vmatmul.msk.f32.vlgmr.msrb.gmra.mxu0 %vm629_vm7, %v623_v40 }
 0x1b2   :  { %1222 = vmatmul.msk.f32.vlgmr.msrb.gmra.mxu1 %vm629_vm7, %v623_v40 }
 0x1b7   :  { %v584_v2 = vpop.f32.mrf.mxu2  ;;  %v604_v3 = vpop.f32.mrf.mxu3 }
 0x1b8   :  { %v609_v4 = vadd.f32 %v584_v2, %v369_v53  ;;  %v610_v5 = vadd.f32 %v604_v3, %v389_v54  ;;  %v929_v54 = vpop.permute.xlu0 %928  ;;  %v1034_v3 = vpop.permute.xlu1 %1033 }
 0x1ba   :  { %v617_v6 = vadd.f32 %v613_v57, %v609_v4  ;;  %v618_v7 = vadd.f32 %v613_v57, %v610_v5 }
 0x1bc   :  { %1277 = vtanh.f32 %v617_v6 }
 0x1bd   :  { %1279 = vtanh.f32 %v618_v7 }
 0x1c2   :  { %v1278_v8 = vpop.eup %1277 }
 0x1c3   :  { %v1280_v9 = vpop.eup %1279  ;;  %687 = vmatpush.msrb.mxu2 %v1278_v8 }
 0x1c4   :  { %707 = vmatpush.msrb.mxu3 %v1280_v9  ;;  %1223 = vmatmul.msk.f32.vlgmr.msrb.gmra.mxu2 %vm629_vm7, %v623_v40 }
 0x1c5   :  { %1224 = vmatmul.msk.f32.vlgmr.msrb.gmra.mxu3 %vm629_vm7, %v623_v40  ;;  %v824_v40 = vpop.permute.xlu2 %823 }
 0x1cd   :  { %v1039_v8 = vpop.permute.xlu2 %1038 }
 0x22e   :  { %v649_v12 = vpop.f32.mrf.mxu0 }
 0x22f   :  { %v650_v13 = vadd.f32 %v649_v12, %v627_v11  ;;  %v669_v14 = vpop.f32.mrf.mxu1 }
 0x230   :  { %v670_v15 = vadd.f32 %v669_v14, %v627_v11 }
 0x231   :  { %1281 = vtanh.f32 %v650_v13 }
 0x232   :  { %1283 = vtanh.f32 %v670_v15 }
 0x237   :  { %v1282_v17 = vpop.eup %1281 }
 0x238   :  { %v1284_v18 = vpop.eup %1283  ;;  %1225 = vmatpush.msk.msra.mxu0 %vm302_vm14, %v1282_v17 }
 0x239   :  { %1227 = vmatpush.msk.msra.mxu1 %vm302_vm14, %v1284_v18  ;;  %1226 = vmatmul.msk.f32.vlgmr.msra.gmra.mxu0 %vm299_vm3, %v716_v10 }
 0x23a   :  { %1228 = vmatmul.msk.f32.vlgmr.msra.gmra.mxu1 %vm299_vm3, %v716_v10 }
 0x247   :  { %v689_v20 = vpop.f32.mrf.mxu2 }
 0x248   :  { %v690_v21 = vadd.f32 %v689_v20, %v627_v11  ;;  %v709_v22 = vpop.f32.mrf.mxu3 }
 0x249   :  { %v710_v23 = vadd.f32 %v709_v22, %v627_v11 }
 0x24a   :  { %1285 = vtanh.f32 %v690_v21 }
 0x24b   :  { %1287 = vtanh.f32 %v710_v23 }
 0x250   :  { %v1286_v24 = vpop.eup %1285 }
 0x251   :  { %v1288_v25 = vpop.eup %1287  ;;  %1229 = vmatpush.msk.msra.mxu2 %vm302_vm14, %v1286_v24 }
 0x252   :  { %1231 = vmatpush.msk.msra.mxu3 %vm302_vm14, %v1288_v25  ;;  %1230 = vmatmul.msk.f32.vlgmr.msra.gmra.mxu2 %vm299_vm3, %v716_v10 }
 0x253   :  { %1232 = vmatmul.msk.f32.vlgmr.msra.gmra.mxu3 %vm299_vm3, %v716_v10 }
 0x2b6   :  { %v753_v27 = vpop.f32.mrf.mxu0 }
 0x2b7   :  { %v754_v28 = vadd.f32 %v753_v27, %v720_v26  ;;  %v773_v29 = vpop.f32.mrf.mxu1 }
 0x2b8   :  { %v774_v30 = vadd.f32 %v773_v29, %v720_v26 }
 0x2b9   :  { %1289 = vtanh.f32 %v754_v28 }
 0x2ba   :  { %1291 = vtanh.f32 %v774_v30 }
 0x2bf   :  { %v1290_v31 = vpop.eup %1289 }
 0x2c0   :  { %v1292_v32 = vpop.eup %1291  ;;  %1233 = vmatpush.msk.msrb.mxu0 %vm98_vm0, %v1290_v31 }
 0x2c1   :  { %1235 = vmatpush.msk.msrb.mxu1 %vm98_vm0, %v1292_v32  ;;  %1234 = vmatmul.msk.f32.vlgmr.msrb.gmra.mxu0 %vm826_vm8, %v820_v16 }
 0x2c2   :  { %1236 = vmatmul.msk.f32.vlgmr.msrb.gmra.mxu1 %vm826_vm8, %v820_v16 }
 0x2d5   :  { %v793_v33 = vpop.f32.mrf.mxu2 }
 0x2d6   :  { %v794_v34 = vadd.f32 %v793_v33, %v720_v26  ;;  %v813_v35 = vpop.f32.mrf.mxu3 }
 0x2d7   :  { %v814_v36 = vadd.f32 %v813_v35, %v720_v26 }
 0x2d8   :  { %1293 = vtanh.f32 %v794_v34 }
 0x2d9   :  { %1295 = vtanh.f32 %v814_v36 }
 0x2de   :  { %v1294_v37 = vpop.eup %1293 }
 0x2df   :  { %v1296_v38 = vpop.eup %1295  ;;  %1237 = vmatpush.msk.msrb.mxu2 %vm98_vm0, %v1294_v37 }
 0x2e0   :  { %1239 = vmatpush.msk.msrb.mxu3 %vm98_vm0, %v1296_v38  ;;  %1238 = vmatmul.msk.f32.vlgmr.msrb.gmra.mxu2 %vm826_vm8, %v820_v16 }
 0x2e1   :  { %1240 = vmatmul.msk.f32.vlgmr.msrb.gmra.mxu3 %vm826_vm8, %v820_v16 }
 0x33e   :  { %v858_v41 = vpop.f32.mrf.mxu0 }
 0x33f   :  { %v859_v42 = vadd.f32 %v858_v41, %v824_v40  ;;  %v878_v43 = vpop.f32.mrf.mxu1 }
 0x340   :  { %v879_v44 = vadd.f32 %v878_v43, %v824_v40 }
 0x341   :  { %1297 = vtanh.f32 %v859_v42 }
 0x342   :  { %1299 = vtanh.f32 %v879_v44 }
 0x347   :  { %v1298_v45 = vpop.eup %1297 }
 0x348   :  { %v1300_v46 = vpop.eup %1299  ;;  %1241 = vmatpush.msk.msra.mxu0 %vm302_vm14, %v1298_v45 }
 0x349   :  { %1243 = vmatpush.msk.msra.mxu1 %vm302_vm14, %v1300_v46  ;;  %1242 = vmatmul.msk.f32.vlgmr.msra.gmra.mxu0 %vm299_vm3, %v925_v39 }
 0x34a   :  { %1244 = vmatmul.msk.f32.vlgmr.msra.gmra.mxu1 %vm299_vm3, %v925_v39 }
 0x363   :  { %v898_v48 = vpop.f32.mrf.mxu2 }
 0x364   :  { %v899_v49 = vadd.f32 %v898_v48, %v824_v40  ;;  %v918_v50 = vpop.f32.mrf.mxu3 }
 0x365   :  { %v919_v51 = vadd.f32 %v918_v50, %v824_v40 }
 0x366   :  { %1301 = vtanh.f32 %v899_v49 }
 0x367   :  { %1303 = vtanh.f32 %v919_v51 }
 0x36c   :  { %v1302_v52 = vpop.eup %1301 }
 0x36d   :  { %v1304_v53 = vpop.eup %1303  ;;  %1245 = vmatpush.msk.msra.mxu2 %vm302_vm14, %v1302_v52 }
 0x36e   :  { %1247 = vmatpush.msk.msra.mxu3 %vm302_vm14, %v1304_v53  ;;  %1246 = vmatmul.msk.f32.vlgmr.msra.gmra.mxu2 %vm299_vm3, %v925_v39 }
 0x36f   :  { %1248 = vmatmul.msk.f32.vlgmr.msra.gmra.mxu3 %vm299_vm3, %v925_v39 }
 0x3c6   :  { %v962_v55 = vpop.f32.mrf.mxu0 }
 0x3c7   :  { %v982_v56 = vpop.f32.mrf.mxu1  ;;  %v963_v57 = vadd.f32 %v962_v55, %v929_v54 }
 0x3c8   :  { %v983_v58 = vadd.f32 %v982_v56, %v929_v54 }
 0x3c9   :  { %1305 = vtanh.f32 %v963_v57 }
 0x3ca   :  { %1307 = vtanh.f32 %v983_v58 }
 0x3cf   :  { %v1306_v59 = vpop.eup %1305 }
 0x3d0   :  { %v1308_v60 = vpop.eup %1307  ;;  %1060 = vmatpush.msrb.mxu0 %v1306_v59 }
 0x3d1   :  { %1083 = vmatpush.msrb.mxu1 %v1308_v60  ;;  %1249 = vmatmul.msk.f32.vlgmr.msrb.gmra.mxu0 %vm629_vm7, %v1509_v47 }
 0x3d2   :  { %1251 = vmatmul.msk.f32.vlgmr.msrb.gmra.mxu1 %vm629_vm7, %v1509_v47 }
 0x3d9   :  { %1250 = vmatmul.msk.f32.gmra.mxu0 %vm629_vm7, %v1527_v19 }
 0x3da   :  { %1252 = vmatmul.msk.f32.gmra.mxu1 %vm629_vm7, %v1527_v19 }
 0x3f1   :  { %v1002_v61 = vpop.f32.mrf.mxu2 }
 0x3f2   :  { %v1003_v62 = vadd.f32 %v1002_v61, %v929_v54  ;;  %v1022_v63 = vpop.f32.mrf.mxu3 }
 0x3f3   :  { %v1023_v0 = vadd.f32 %v1022_v63, %v929_v54 }
 0x3f4   :  { %1309 = vtanh.f32 %v1003_v62 }
 0x3f5   :  { %1311 = vtanh.f32 %v1023_v0 }
 0x3fa   :  { %v1310_v1 = vpop.eup %1309 }
 0x3fb   :  { %v1312_v2 = vpop.eup %1311  ;;  %1106 = vmatpush.msrb.mxu2 %v1310_v1 }
 0x3fc   :  { %1129 = vmatpush.msrb.mxu3 %v1312_v2  ;;  %1253 = vmatmul.msk.f32.vlgmr.msrb.gmra.mxu2 %vm629_vm7, %v1509_v47 }
 0x3fd   :  { %1255 = vmatmul.msk.f32.vlgmr.msrb.gmra.mxu3 %vm629_vm7, %v1509_v47 }
 0x404   :  { %1254 = vmatmul.msk.f32.gmra.mxu2 %vm629_vm7, %v1527_v19 }
 0x405   :  { %1256 = vmatmul.msk.f32.gmra.mxu3 %vm629_vm7, %v1527_v19 }
 0x44e   :  { %v1062_v4 = vpop.f32.mrf.mxu0 }
 0x44f   :  { %v1063_v5 = vadd.f32 %v1062_v4, %v1034_v3  ;;  %v1085_v6 = vpop.f32.mrf.mxu1 }
 0x450   :  { %v1086_v7 = vadd.f32 %v1085_v6, %v1034_v3 }
 0x451   :  { %1137 = vst [vmem:[#allocation8] sm:$0xff] %v1063_v5 }
 0x452   :  { %1138 = vst [vmem:[#allocation8 + $0x8] sm:$0xff] %v1086_v7 }
 0x456   :  { %v1065_v9 = vpop.f32.mrf.mxu0 }
 0x457   :  { %v1066_v10 = vadd.f32 %v1065_v9, %v1039_v8  ;;  %v1088_v11 = vpop.f32.mrf.mxu1 }
 0x458   :  { %v1089_v12 = vadd.f32 %v1088_v11, %v1039_v8 }
 0x459   :  { %1141 = vst [vmem:[#allocation8 + $0x20] sm:$0xf] %v1066_v10 }
 0x45a   :  { %1142 = vst [vmem:[#allocation8 + $0x28] sm:$0xf] %v1089_v12 }
 0x47f   :  { %v1108_v47 = vpop.f32.mrf.mxu2 }
 0x480   :  { %v1109_v13 = vadd.f32 %v1108_v47, %v1034_v3  ;;  %v1131_v14 = vpop.f32.mrf.mxu3 }
 0x481   :  { %v1132_v15 = vadd.f32 %v1131_v14, %v1034_v3 }
 0x482   :  { %1139 = vst [vmem:[#allocation8 + $0x10] sm:$0xff] %v1109_v13 }
 0x483   :  { %1140 = vst [vmem:[#allocation8 + $0x18] sm:$0xff] %v1132_v15 }
 0x487   :  { %v1111_v16 = vpop.f32.mrf.mxu2 }
 0x488   :  { %v1112_v17 = vadd.f32 %v1111_v16, %v1039_v8  ;;  %v1134_v18 = vpop.f32.mrf.mxu3 }
 0x489   :  { %v1135_v19 = vadd.f32 %v1134_v18, %v1039_v8 }
 0x48a   :  { %1143 = vst [vmem:[#allocation8 + $0x30] sm:$0xf] %v1112_v17 }
 0x48b   :  { %1144 = vst [vmem:[#allocation8 + $0x38] sm:$0xf] %v1135_v19 }
 0x48c   :  { %1157 = dma.vmem_to_hbm [thread:$0]  %s1150_s29, 1024, %s1152_s5, [#allocation4], %s1426_s6, %s1426_s6, %s1427_s7  }
 0x48d   :  { %1413 = dma.done.wait [#allocation4], 1024  }
 0x48e   :  { %1414 = vsyncadd [#allocation4], 4294966272 }
 0x48f   :  { %1162 = vsyncpa [#allocation3], 1 }
 0x490   :  { %1163 = vsyncpa [#allocation6], 1 }
 0x491   :  { %1164 = vsyncpa [#allocation4], 1 }

</bundles_post_ra>
